<compile_context>
chip_gen: v6e
topology: v6e:2x2x1
jax: 0.10.0
libtpu: 0.0.40
codegen_flags: <defaults>
</compile_context>

<pallas_src>
import math
import jax
import jax.numpy as jnp
from jax import lax
from jax.experimental import pallas as pl
from jax.experimental.pallas import tpu as pltpu

EPS_NORM = 1e-5   # RevIN Normalize eps
EPS_COS = 1e-8    # F.cosine_similarity eps


# ----------------------------------------------------------------------------
# Kernel 1: RevIN norm + replication pad + patch unfold + patch projection
# ----------------------------------------------------------------------------
def _make_norm_patch_kernel(stride):
    def kernel(x_ref, w_ref, b_ref, emb_ref, mu_ref, sd_ref):
        T = x_ref.shape[1]
        N = x_ref.shape[2]
        patch_len, D = w_ref.shape
        P = emb_ref.shape[2] // D

        x = x_ref[0]                                          # (T, N) f32
        mu = jnp.mean(x, axis=0, keepdims=True)               # (1, N)
        var = jnp.mean((x - mu) ** 2, axis=0, keepdims=True)  # unbiased=False
        sd = jnp.sqrt(var + EPS_NORM)
        xn = (x - mu) / sd                                    # (T, N)
        mu_ref[0] = mu
        sd_ref[0] = sd

        # ReplicationPad1d((0, stride)) along time, then cast once to bf16.
        pad = jnp.broadcast_to(xn[T - 1:T, :], (stride, N))
        xp = jnp.concatenate([xn, pad], axis=0).astype(jnp.bfloat16)  # (T+s, N)

        w = w_ref[...]                                        # (patch_len, D) bf16
        b = b_ref[...].astype(jnp.float32)                    # (1, D)

        # One small matmul per patch; bf16 operands, f32 accumulation (MXU).
        cols = []
        for p in range(P):
            patch = xp[p * stride: p * stride + patch_len, :]  # (patch_len, N)
            acc = lax.dot_general(patch, w, (((0,), (0,)), ((), ())),
                                  preferred_element_type=jnp.float32)  # (N, D)
            cols.append((acc + b).astype(jnp.bfloat16))
        # Single lane-dense store: (N, P*D) with P*D on the 128-lane axis.
        emb_ref[0] = jnp.concatenate(cols, axis=1)
    return kernel


def norm_patch_embed(x_btn, w_patch_bf16, b_patch_bf16, patch_len, stride):
    B, T, N = x_btn.shape
    D = w_patch_bf16.shape[1]
    P = (T + stride - patch_len) // stride + 1
    out_shapes = (jax.ShapeDtypeStruct((B, N, P * D), jnp.bfloat16),
                  jax.ShapeDtypeStruct((B, 1, N), jnp.float32),
                  jax.ShapeDtypeStruct((B, 1, N), jnp.float32))
    emb, mu, sd = pl.pallas_call(
        _make_norm_patch_kernel(stride),
        grid=(B,),
        in_specs=[pl.BlockSpec((1, T, N), lambda b: (b, 0, 0)),
                  pl.BlockSpec((patch_len, D), lambda b: (0, 0)),
                  pl.BlockSpec((1, D), lambda b: (0, 0))],
        out_specs=[pl.BlockSpec((1, N, P * D), lambda b: (b, 0, 0)),
                   pl.BlockSpec((1, 1, N), lambda b: (b, 0, 0)),
                   pl.BlockSpec((1, 1, N), lambda b: (b, 0, 0))],
        out_shape=out_shapes,
        compiler_params=pltpu.CompilerParams(
            dimension_semantics=("parallel",)),
    )(x_btn, w_patch_bf16, b_patch_bf16.reshape(1, D))
    return emb, mu, sd, P


# ----------------------------------------------------------------------------
# Kernel 2: mapping_layer (w_map^T @ oti + b) + cosine similarity (per-norm
#           clamped, matching F.cosine_similarity), no in-kernel transposes.
# ----------------------------------------------------------------------------
def _map_sim_kernel(enc_ref, oti_ref, wm_ref, bm_ref, src_ref, sim_ref):
    # source_embeddings[t, d] = sum_v w_map[v, t] * oti[v, d] + b[t]
    src = lax.dot_general(wm_ref[...], oti_ref[...], (((0,), (0,)), ((), ())),
                          preferred_element_type=jnp.float32)       # (V, D)
    src = src + bm_ref[...]                                         # (V, 1) bcast
    src_ref[...] = src

    e = enc_ref[...].astype(jnp.float32)                            # (M, P, D)
    ts = jnp.mean(e, axis=1)                                        # (M, D)
    tn = jnp.sqrt(jnp.sum(ts * ts, axis=-1, keepdims=True))         # (M, 1)
    ln = jnp.sqrt(jnp.sum(src * src, axis=-1, keepdims=True))       # (V, 1)
    ts_n = (ts / jnp.maximum(tn, EPS_COS)).astype(jnp.bfloat16)
    src_n = (src / jnp.maximum(ln, EPS_COS)).astype(jnp.bfloat16)
    # bf16 operands, f32 accumulation; contract last dims (no lex transpose).
    sim_ref[...] = lax.dot_general(ts_n, src_n, (((1,), (1,)), ((), ())),
                                   preferred_element_type=jnp.float32)


def mapping_and_similarity(enc_out, oti, w_map, b_map):
    M, P, D = enc_out.shape
    V0, V = w_map.shape
    return pl.pallas_call(
        _map_sim_kernel,
        grid=(1,),
        in_specs=[pl.BlockSpec((M, P, D), lambda i: (0, 0, 0)),
                  pl.BlockSpec((V0, D), lambda i: (0, 0)),
                  pl.BlockSpec((V0, V), lambda i: (0, 0)),
                  pl.BlockSpec((V, 1), lambda i: (0, 0))],
        out_specs=[pl.BlockSpec((V, D), lambda i: (0, 0)),
                   pl.BlockSpec((M, V), lambda i: (0, 0))],
        out_shape=(jax.ShapeDtypeStruct((V, D), jnp.float32),
                   jax.ShapeDtypeStruct((M, V), jnp.float32)),
    )(enc_out, oti, w_map, b_map.reshape(V, 1))


# ----------------------------------------------------------------------------
# Kernel 3: d_ff slice + last-patch_nums slice + FlattenHead + RevIN denorm
# ----------------------------------------------------------------------------
def _head_denorm_kernel(dec_ref, w_ref, b_ref, mu_ref, sd_ref, o_ref):
    N = dec_ref.shape[1]
    L = dec_ref.shape[2]
    Pn, d_ff, pred_len = w_ref.shape

    dec = dec_ref[0]                                   # (N, L, D) f32
    w3 = w_ref[...]                                    # (Pn, d_ff, pred_len)
    acc = jnp.zeros((N, pred_len), jnp.float32)
    # Per-patch matmul accumulation == Linear over the (d_ff, Pn)-flattened
    # features (weight pre-permuted in the wrapper so no in-kernel reshape).
    for p in range(Pn):
        x_p = dec[:, L - Pn + p, :d_ff]                # (N, d_ff)
        acc = acc + jnp.dot(x_p, w3[p], preferred_element_type=jnp.float32)
    h = acc + b_ref[...]                               # (N, pred_len)
    # Denorm + final permute to (pred_len, N).
    o_ref[0] = h.T * sd_ref[0] + mu_ref[0]


def head_and_denorm(dec_bnld, w_head, b_head, mu, sd, d_ff, patch_nums,
                    pred_len):
    B, N, L, D = dec_bnld.shape
    # Reorder Linear(head_nf, pred_len) rows from (f*Pn + p) to (p, f) order.
    w3 = w_head.reshape(d_ff, patch_nums, pred_len).transpose(1, 0, 2)
    return pl.pallas_call(
        _head_denorm_kernel,
        grid=(B,),
        in_specs=[pl.BlockSpec((1, N, L, D), lambda b: (b, 0, 0, 0)),
                  pl.BlockSpec((patch_nums, d_ff, pred_len),
                               lambda b: (0, 0, 0)),
                  pl.BlockSpec((1, pred_len), lambda b: (0, 0)),
                  pl.BlockSpec((1, 1, N), lambda b: (b, 0, 0)),
                  pl.BlockSpec((1, 1, N), lambda b: (b, 0, 0))],
        out_specs=pl.BlockSpec((1, pred_len, N), lambda b: (b, 0, 0)),
        out_shape=jax.ShapeDtypeStruct((B, pred_len, N), jnp.float32),
        compiler_params=pltpu.CompilerParams(
            dimension_semantics=("parallel",)),
    )(dec_bnld, w3, b_head.reshape(1, pred_len), mu, sd)


# ----------------------------------------------------------------------------
# Full forward
# ----------------------------------------------------------------------------
def model_forward(params, x_enc, oti_pseudo_tokens, cfg):
    B, T, N = x_enc.shape
    D = params["w_patch"].shape[1]
    d_ff, patch_nums, pred_len = cfg["d_ff"], cfg["patch_nums"], cfg["pred_len"]

    # K1: RevIN 'norm' + patch embedding (bf16 to the MXU, f32 stats).
    emb, mu, sd, P = norm_patch_embed(
        x_enc,
        params["w_patch"].astype(jnp.bfloat16),
        params["b_patch"].astype(jnp.bfloat16),
        cfg["patch_len"], cfg["stride"])
    enc_out = emb.reshape(B * N, P, D)                 # bitcast reshape, bf16

    if cfg.get("stats", False):
        # TODO(synk): prompt-string construction, HF tokenizer and frozen-LLM
        # prompt embeddings (min/max/median/trend/FFT-lag statistics feed only
        # this branch) have no Pallas equivalent; stats == False drops it.
        raise NotImplementedError("stats/prompt branch not translated")

    # K2: mapping_layer + cosine similarity (no double transpose).
    source_embeddings, similarity = mapping_and_similarity(
        enc_out, oti_pseudo_tokens, params["w_map"], params["b_map"])

    # top-k lexicon gather (XLA).
    _, top_idx = jax.lax.top_k(similarity, cfg["rep_k"])        # (B*N, k)
    top_k_lexicon = jnp.take(source_embeddings, top_idx, axis=0)  # (B*N, k, D)

    enc_with_prompts = jnp.concatenate(
        [top_k_lexicon, enc_out.astype(jnp.float32)], axis=1)   # (B*N, L, D)

    # TODO(synk): frozen LLM backbone (llm_model(inputs_embeds=...)) replaced
    # by identity on the embedded sequence.
    llm_out = enc_with_prompts
    L = llm_out.shape[1]
    dec_in = llm_out.reshape(B, N, L, D)

    # K3: slice to d_ff / last patch_nums + FlattenHead + RevIN 'denorm'.
    dec_out = head_and_denorm(dec_in, params["w_head"], params["b_head"],
                              mu, sd, d_ff, patch_nums, pred_len)
    return dec_out[:, -pred_len:, :]


# ----------------------------------------------------------------------------
# Main
# ----------------------------------------------------------------------------
if __name__ == "__main__":
    # Small, forward-consistent configuration.
    B, N = 2, 4                       # batch, enc_in (variables)
    seq_len, pred_len = 32, 8
    patch_len, stride = 16, 8
    D = 32                            # embedding_dim (stand-in for llm dim)
    d_ff = 16
    num_tokens = 16                   # mapping_layer output tokens
    V0 = 64                           # oti_pseudo_tokens rows
    rep_k = 3
    patch_nums = int((seq_len - patch_len) / stride + 2)       # = 4
    head_nf = d_ff * patch_nums

    cfg = dict(patch_len=patch_len, stride=stride, d_ff=d_ff,
               patch_nums=patch_nums, pred_len=pred_len,
               rep_k=rep_k, stats=False)

    key = jax.random.PRNGKey(0)
    k_x, k_tok, k_p, k_m, k_mb, k_h, k_hb = jax.random.split(key, 7)

    x_enc = jax.random.normal(k_x, (B, seq_len, N), jnp.float32)
    oti_pseudo_tokens = jax.random.normal(k_tok, (V0, D), jnp.float32)

    params = {
        # patch projection: Linear(patch_len -> D)
        "w_patch": jax.random.normal(k_p, (patch_len, D), jnp.float32)
                   / math.sqrt(patch_len),
        "b_patch": jnp.zeros((D,), jnp.float32),
        # mapping_layer: Linear(V0 -> num_tokens)
        "w_map": jax.random.normal(k_m, (V0, num_tokens), jnp.float32)
                 / math.sqrt(V0),
        "b_map": jax.random.normal(k_mb, (num_tokens,), jnp.float32) * 0.01,
        # FlattenHead: Linear(head_nf -> pred_len)
        "w_head": jax.random.normal(k_h, (head_nf, pred_len), jnp.float32)
                  / math.sqrt(head_nf),
        "b_head": jax.random.normal(k_hb, (pred_len,), jnp.float32) * 0.01,
    }

    fwd = jax.jit(lambda p, x, t: model_forward(p, x, t, cfg))
    out = fwd(params, x_enc, oti_pseudo_tokens)
    out = jax.block_until_ready(out)
    assert out.shape == (B, pred_len, N), out.shape
    assert bool(jnp.all(jnp.isfinite(out)))
    print("KERNEL_OK")
</pallas_src>

<mosaic_0001>
module attributes {stable_mosaic.version = 11 : i64} {
  func.func @kernel(%arg0: i32, %arg1: memref<1x32x4xf32, #tpu.memory_space<vmem>>, %arg2: memref<16x32xbf16, #tpu.memory_space<vmem>>, %arg3: memref<1x32xbf16, #tpu.memory_space<vmem>>, %arg4: memref<1x4x128xbf16, #tpu.memory_space<vmem>>, %arg5: memref<1x1x4xf32, #tpu.memory_space<vmem>>, %arg6: memref<1x1x4xf32, #tpu.memory_space<vmem>>) attributes {dimension_semantics = [#tpu.dimension_semantics<parallel>], iteration_bounds = array<i64: 2>, scalar_prefetch = 0 : i64, scratch_operands = 0 : i64, tpu.core_type = #tpu.core_type<tc>, window_params = [{transform_indices = @transform_0, window_bounds = array<i64: 1, 32, 4>}, {pipeline_mode = #tpu.pipeline_mode<synchronous>, transform_indices = @transform_1, window_bounds = array<i64: 16, 32>}, {pipeline_mode = #tpu.pipeline_mode<synchronous>, transform_indices = @transform_2, window_bounds = array<i64: 1, 32>}, {transform_indices = @transform_3, window_bounds = array<i64: 1, 4, 128>}, {transform_indices = @transform_4, window_bounds = array<i64: 1, 1, 4>}, {transform_indices = @transform_5, window_bounds = array<i64: 1, 1, 4>}]} {
    %c0 = arith.constant 0 : index
    %c0_0 = arith.constant 0 : index
    %c0_1 = arith.constant 0 : index
    %0 = vector.load %arg1[%c0, %c0_0, %c0_1] : memref<1x32x4xf32, #tpu.memory_space<vmem>>, vector<1x32x4xf32>
    %1 = vector.shape_cast %0 : vector<1x32x4xf32> to vector<32x4xf32>
    %cst = arith.constant dense<0.000000e+00> : vector<4xf32>
    %2 = vector.multi_reduction <add>, %1, %cst [0] : vector<32x4xf32> to vector<4xf32>
    %3 = vector.shape_cast %2 : vector<4xf32> to vector<1x4xf32>
    %cst_2 = arith.constant 3.200000e+01 : f32
    %4 = vector.broadcast %cst_2 : f32 to vector<1x4xf32>
    %5 = arith.divf %3, %4 : vector<1x4xf32>
    %6 = vector.broadcast %5 : vector<1x4xf32> to vector<32x4xf32>
    %7 = arith.subf %1, %6 : vector<32x4xf32>
    %8 = arith.mulf %7, %7 : vector<32x4xf32>
    %cst_3 = arith.constant dense<0.000000e+00> : vector<4xf32>
    %9 = vector.multi_reduction <add>, %8, %cst_3 [0] : vector<32x4xf32> to vector<4xf32>
    %10 = vector.shape_cast %9 : vector<4xf32> to vector<1x4xf32>
    %cst_4 = arith.constant 3.200000e+01 : f32
    %11 = vector.broadcast %cst_4 : f32 to vector<1x4xf32>
    %12 = arith.divf %10, %11 : vector<1x4xf32>
    %cst_5 = arith.constant 9.99999974E-6 : f32
    %13 = vector.broadcast %cst_5 : f32 to vector<1x4xf32>
    %14 = arith.addf %12, %13 : vector<1x4xf32>
    %15 = math.sqrt %14 : vector<1x4xf32>
    %16 = vector.broadcast %5 : vector<1x4xf32> to vector<32x4xf32>
    %17 = arith.subf %1, %16 : vector<32x4xf32>
    %18 = vector.broadcast %15 : vector<1x4xf32> to vector<32x4xf32>
    %19 = arith.divf %17, %18 : vector<32x4xf32>
    %c0_6 = arith.constant 0 : index
    %c0_7 = arith.constant 0 : index
    %c0_8 = arith.constant 0 : index
    %20 = vector.load %arg5[%c0_6, %c0_7, %c0_8] : memref<1x1x4xf32, #tpu.memory_space<vmem>>, vector<1x1x4xf32>
    %21 = vector.shape_cast %20 : vector<1x1x4xf32> to vector<1x4xf32>
    %22 = vector.shape_cast %5 : vector<1x4xf32> to vector<1x1x4xf32>
    tpu.vector_store %arg5[%c0_6, %c0_7, %c0_8], %22 {strides = array<i32>} : memref<1x1x4xf32, #tpu.memory_space<vmem>>, vector<1x1x4xf32>,
    %c0_9 = arith.constant 0 : index
    %c0_10 = arith.constant 0 : index
    %c0_11 = arith.constant 0 : index
    %23 = vector.load %arg6[%c0_9, %c0_10, %c0_11] : memref<1x1x4xf32, #tpu.memory_space<vmem>>, vector<1x1x4xf32>
    %24 = vector.shape_cast %23 : vector<1x1x4xf32> to vector<1x4xf32>
    %25 = vector.shape_cast %15 : vector<1x4xf32> to vector<1x1x4xf32>
    tpu.vector_store %arg6[%c0_9, %c0_10, %c0_11], %25 {strides = array<i32>} : memref<1x1x4xf32, #tpu.memory_space<vmem>>, vector<1x1x4xf32>,
    %26 = vector.extract_strided_slice %19 {offsets = [31, 0], sizes = [1, 4], strides = [1, 1]} : vector<32x4xf32> to vector<1x4xf32>
    %27 = vector.shape_cast %26 : vector<1x4xf32> to vector<1x4xf32>
    %28 = vector.broadcast %27 : vector<1x4xf32> to vector<8x4xf32>
    %29 = tpu.concatenate %19, %28 in 0 : vector<32x4xf32>, vector<8x4xf32> -> vector<40x4xf32>
    %30 = arith.truncf %29 : vector<40x4xf32> to vector<40x4xbf16>
    %c0_12 = arith.constant 0 : index
    %c0_13 = arith.constant 0 : index
    %31 = vector.load %arg2[%c0_12, %c0_13] : memref<16x32xbf16, #tpu.memory_space<vmem>>, vector<16x32xbf16>
    %c0_14 = arith.constant 0 : index
    %c0_15 = arith.constant 0 : index
    %32 = vector.load %arg3[%c0_14, %c0_15] : memref<1x32xbf16, #tpu.memory_space<vmem>>, vector<1x32xbf16>
    %33 = arith.extf %32 : vector<1x32xbf16> to vector<1x32xf32>
    %34 = vector.extract_strided_slice %30 {offsets = [0, 0], sizes = [16, 4], strides = [1, 1]} : vector<40x4xbf16> to vector<16x4xbf16>
    %cst_16 = arith.constant dense<0.000000e+00> : vector<4x32xf32>
    %35 = tpu.matmul %34, %31, %cst_16 {dimension_numbers = #tpu.dot_dimension_numbers<[0], [0], [1], [1], [0, 1, 1, 1], [], []>} : vector<16x4xbf16>, vector<16x32xbf16>, vector<4x32xf32> -> vector<4x32xf32>
    %36 = vector.broadcast %33 : vector<1x32xf32> to vector<4x32xf32>
    %37 = arith.addf %35, %36 : vector<4x32xf32>
    %38 = arith.truncf %37 : vector<4x32xf32> to vector<4x32xbf16>
    %39 = vector.extract_strided_slice %30 {offsets = [8, 0], sizes = [16, 4], strides = [1, 1]} : vector<40x4xbf16> to vector<16x4xbf16>
    %cst_17 = arith.constant dense<0.000000e+00> : vector<4x32xf32>
    %40 = tpu.matmul %39, %31, %cst_17 {dimension_numbers = #tpu.dot_dimension_numbers<[0], [0], [1], [1], [0, 1, 1, 1], [], []>} : vector<16x4xbf16>, vector<16x32xbf16>, vector<4x32xf32> -> vector<4x32xf32>
    %41 = vector.broadcast %33 : vector<1x32xf32> to vector<4x32xf32>
    %42 = arith.addf %40, %41 : vector<4x32xf32>
    %43 = arith.truncf %42 : vector<4x32xf32> to vector<4x32xbf16>
    %44 = vector.extract_strided_slice %30 {offsets = [16, 0], sizes = [16, 4], strides = [1, 1]} : vector<40x4xbf16> to vector<16x4xbf16>
    %cst_18 = arith.constant dense<0.000000e+00> : vector<4x32xf32>
    %45 = tpu.matmul %44, %31, %cst_18 {dimension_numbers = #tpu.dot_dimension_numbers<[0], [0], [1], [1], [0, 1, 1, 1], [], []>} : vector<16x4xbf16>, vector<16x32xbf16>, vector<4x32xf32> -> vector<4x32xf32>
    %46 = vector.broadcast %33 : vector<1x32xf32> to vector<4x32xf32>
    %47 = arith.addf %45, %46 : vector<4x32xf32>
    %48 = arith.truncf %47 : vector<4x32xf32> to vector<4x32xbf16>
    %49 = vector.extract_strided_slice %30 {offsets = [24, 0], sizes = [16, 4], strides = [1, 1]} : vector<40x4xbf16> to vector<16x4xbf16>
    %cst_19 = arith.constant dense<0.000000e+00> : vector<4x32xf32>
    %50 = tpu.matmul %49, %31, %cst_19 {dimension_numbers = #tpu.dot_dimension_numbers<[0], [0], [1], [1], [0, 1, 1, 1], [], []>} : vector<16x4xbf16>, vector<16x32xbf16>, vector<4x32xf32> -> vector<4x32xf32>
    %51 = vector.broadcast %33 : vector<1x32xf32> to vector<4x32xf32>
    %52 = arith.addf %50, %51 : vector<4x32xf32>
    %53 = arith.truncf %52 : vector<4x32xf32> to vector<4x32xbf16>
    %54 = tpu.concatenate %38, %43, %48, %53 in 1 : vector<4x32xbf16>, vector<4x32xbf16>, vector<4x32xbf16>, vector<4x32xbf16> -> vector<4x128xbf16>
    %c0_20 = arith.constant 0 : index
    %c0_21 = arith.constant 0 : index
    %c0_22 = arith.constant 0 : index
    %55 = vector.load %arg4[%c0_20, %c0_21, %c0_22] : memref<1x4x128xbf16, #tpu.memory_space<vmem>>, vector<1x4x128xbf16>
    %56 = vector.shape_cast %55 : vector<1x4x128xbf16> to vector<4x128xbf16>
    %57 = vector.shape_cast %54 : vector<4x128xbf16> to vector<1x4x128xbf16>
    tpu.vector_store %arg4[%c0_20, %c0_21, %c0_22], %57 {strides = array<i32>} : memref<1x4x128xbf16, #tpu.memory_space<vmem>>, vector<1x4x128xbf16>,
    return
  }
  func.func @transform_0(%arg0: i32) -> (i32, i32, i32) {
    %c0_i32 = arith.constant 0 : i32
    %c0_i32_0 = arith.constant 0 : i32
    %c0_i32_1 = arith.constant 0 : i32
    return %arg0, %c0_i32, %c0_i32_0 : i32, i32, i32
  }
  func.func @transform_1(%arg0: i32) -> (i32, i32) {
    %c0_i32 = arith.constant 0 : i32
    %c0_i32_0 = arith.constant 0 : i32
    %c0_i32_1 = arith.constant 0 : i32
    return %c0_i32, %c0_i32_0 : i32, i32
  }
  func.func @transform_2(%arg0: i32) -> (i32, i32) {
    %c0_i32 = arith.constant 0 : i32
    %c0_i32_0 = arith.constant 0 : i32
    %c0_i32_1 = arith.constant 0 : i32
    return %c0_i32, %c0_i32_0 : i32, i32
  }
  func.func @transform_3(%arg0: i32) -> (i32, i32, i32) {
    %c0_i32 = arith.constant 0 : i32
    %c0_i32_0 = arith.constant 0 : i32
    %c0_i32_1 = arith.constant 0 : i32
    return %arg0, %c0_i32, %c0_i32_0 : i32, i32, i32
  }
  func.func @transform_4(%arg0: i32) -> (i32, i32, i32) {
    %c0_i32 = arith.constant 0 : i32
    %c0_i32_0 = arith.constant 0 : i32
    %c0_i32_1 = arith.constant 0 : i32
    return %arg0, %c0_i32, %c0_i32_0 : i32, i32, i32
  }
  func.func @transform_5(%arg0: i32) -> (i32, i32, i32) {
    %c0_i32 = arith.constant 0 : i32
    %c0_i32_0 = arith.constant 0 : i32
    %c0_i32_1 = arith.constant 0 : i32
    return %arg0, %c0_i32, %c0_i32_0 : i32, i32, i32
  }
}

module attributes {stable_mosaic.version = 11 : i64} {
  func.func @_map_sim_kernel(%arg0: i32, %arg1: memref<8x4x32xbf16, #tpu.memory_space<vmem>>, %arg2: memref<64x32xf32, #tpu.memory_space<vmem>>, %arg3: memref<64x16xf32, #tpu.memory_space<vmem>>, %arg4: memref<16x1xf32, #tpu.memory_space<vmem>>, %arg5: memref<16x32xf32, #tpu.memory_space<vmem>>, %arg6: memref<8x16xf32, #tpu.memory_space<vmem>>) attributes {dimension_semantics = [#tpu.dimension_semantics<arbitrary>], iteration_bounds = array<i64: 1>, scalar_prefetch = 0 : i64, scratch_operands = 0 : i64, tpu.core_type = #tpu.core_type<tc>, window_params = [{pipeline_mode = #tpu.pipeline_mode<synchronous>, transform_indices = @transform_0, window_bounds = array<i64: 8, 4, 32>}, {pipeline_mode = #tpu.pipeline_mode<synchronous>, transform_indices = @transform_1, window_bounds = array<i64: 64, 32>}, {pipeline_mode = #tpu.pipeline_mode<synchronous>, transform_indices = @transform_2, window_bounds = array<i64: 64, 16>}, {pipeline_mode = #tpu.pipeline_mode<synchronous>, transform_indices = @transform_3, window_bounds = array<i64: 16, 1>}, {pipeline_mode = #tpu.pipeline_mode<synchronous>, transform_indices = @transform_4, window_bounds = array<i64: 16, 32>}, {pipeline_mode = #tpu.pipeline_mode<synchronous>, transform_indices = @transform_5, window_bounds = array<i64: 8, 16>}]} {
    %c0 = arith.constant 0 : index
    %c0_0 = arith.constant 0 : index
    %0 = vector.load %arg3[%c0, %c0_0] : memref<64x16xf32, #tpu.memory_space<vmem>>, vector<64x16xf32>
    %c0_1 = arith.constant 0 : index
    %c0_2 = arith.constant 0 : index
    %1 = vector.load %arg2[%c0_1, %c0_2] : memref<64x32xf32, #tpu.memory_space<vmem>>, vector<64x32xf32>
    %cst = arith.constant dense<0.000000e+00> : vector<16x32xf32>
    %2 = tpu.matmul %0, %1, %cst {dimension_numbers = #tpu.dot_dimension_numbers<[0], [0], [1], [1], [0, 1, 1, 1], [], []>} : vector<64x16xf32>, vector<64x32xf32>, vector<16x32xf32> -> vector<16x32xf32>
    %c0_3 = arith.constant 0 : index
    %c0_4 = arith.constant 0 : index
    %3 = vector.load %arg4[%c0_3, %c0_4] : memref<16x1xf32, #tpu.memory_space<vmem>>, vector<16x1xf32>
    %4 = vector.broadcast %3 : vector<16x1xf32> to vector<16x32xf32>
    %5 = arith.addf %2, %4 : vector<16x32xf32>
    %c0_5 = arith.constant 0 : index
    %c0_6 = arith.constant 0 : index
    %6 = vector.load %arg5[%c0_5, %c0_6] : memref<16x32xf32, #tpu.memory_space<vmem>>, vector<16x32xf32>
    tpu.vector_store %arg5[%c0_5, %c0_6], %5 {strides = array<i32>} : memref<16x32xf32, #tpu.memory_space<vmem>>, vector<16x32xf32>,
    %c0_7 = arith.constant 0 : index
    %c0_8 = arith.constant 0 : index
    %c0_9 = arith.constant 0 : index
    %7 = vector.load %arg1[%c0_7, %c0_8, %c0_9] : memref<8x4x32xbf16, #tpu.memory_space<vmem>>, vector<8x4x32xbf16>
    %8 = arith.extf %7 : vector<8x4x32xbf16> to vector<8x4x32xf32>
    %cst_10 = arith.constant dense<0.000000e+00> : vector<8x32xf32>
    %9 = vector.multi_reduction <add>, %8, %cst_10 [1] : vector<8x4x32xf32> to vector<8x32xf32>
    %cst_11 = arith.constant 4.000000e+00 : f32
    %10 = vector.broadcast %cst_11 : f32 to vector<8x32xf32>
    %11 = arith.divf %9, %10 : vector<8x32xf32>
    %12 = arith.mulf %11, %11 : vector<8x32xf32>
    %cst_12 = arith.constant dense<0.000000e+00> : vector<8xf32>
    %13 = vector.multi_reduction <add>, %12, %cst_12 [1] : vector<8x32xf32> to vector<8xf32>
    %14 = vector.shape_cast %13 : vector<8xf32> to vector<8x1xf32>
    %15 = math.sqrt %14 : vector<8x1xf32>
    %16 = arith.mulf %5, %5 : vector<16x32xf32>
    %cst_13 = arith.constant dense<0.000000e+00> : vector<16xf32>
    %17 = vector.multi_reduction <add>, %16, %cst_13 [1] : vector<16x32xf32> to vector<16xf32>
    %18 = vector.shape_cast %17 : vector<16xf32> to vector<16x1xf32>
    %19 = math.sqrt %18 : vector<16x1xf32>
    %cst_14 = arith.constant 9.99999993E-9 : f32
    %20 = vector.broadcast %cst_14 : f32 to vector<8x1xf32>
    %21 = arith.maximumf %15, %20 : vector<8x1xf32>
    %22 = vector.broadcast %21 : vector<8x1xf32> to vector<8x32xf32>
    %23 = arith.divf %11, %22 : vector<8x32xf32>
    %24 = arith.truncf %23 : vector<8x32xf32> to vector<8x32xbf16>
    %cst_15 = arith.constant 9.99999993E-9 : f32
    %25 = vector.broadcast %cst_15 : f32 to vector<16x1xf32>
    %26 = arith.maximumf %19, %25 : vector<16x1xf32>
    %27 = vector.broadcast %26 : vector<16x1xf32> to vector<16x32xf32>
    %28 = arith.divf %5, %27 : vector<16x32xf32>
    %29 = arith.truncf %28 : vector<16x32xf32> to vector<16x32xbf16>
    %cst_16 = arith.constant dense<0.000000e+00> : vector<8x16xf32>
    %30 = tpu.matmul %24, %29, %cst_16 {dimension_numbers = #tpu.dot_dimension_numbers<[1], [1], [0], [0], [0, 0, 1, 0], [], []>} : vector<8x32xbf16>, vector<16x32xbf16>, vector<8x16xf32> -> vector<8x16xf32>
    %c0_17 = arith.constant 0 : index
    %c0_18 = arith.constant 0 : index
    %31 = vector.load %arg6[%c0_17, %c0_18] : memref<8x16xf32, #tpu.memory_space<vmem>>, vector<8x16xf32>
    tpu.vector_store %arg6[%c0_17, %c0_18], %30 {strides = array<i32>} : memref<8x16xf32, #tpu.memory_space<vmem>>, vector<8x16xf32>,
    return
  }
  func.func @transform_0(%arg0: i32) -> (i32, i32, i32) {
    %c0_i32 = arith.constant 0 : i32
    %c0_i32_0 = arith.constant 0 : i32
    %c0_i32_1 = arith.constant 0 : i32
    %c0_i32_2 = arith.constant 0 : i32
    return %c0_i32, %c0_i32_0, %c0_i32_1 : i32, i32, i32
  }
  func.func @transform_1(%arg0: i32) -> (i32, i32) {
    %c0_i32 = arith.constant 0 : i32
    %c0_i32_0 = arith.constant 0 : i32
    %c0_i32_1 = arith.constant 0 : i32
    return %c0_i32, %c0_i32_0 : i32, i32
  }
  func.func @transform_2(%arg0: i32) -> (i32, i32) {
    %c0_i32 = arith.constant 0 : i32
    %c0_i32_0 = arith.constant 0 : i32
    %c0_i32_1 = arith.constant 0 : i32
    return %c0_i32, %c0_i32_0 : i32, i32
  }
  func.func @transform_3(%arg0: i32) -> (i32, i32) {
    %c0_i32 = arith.constant 0 : i32
    %c0_i32_0 = arith.constant 0 : i32
    %c0_i32_1 = arith.constant 0 : i32
    return %c0_i32, %c0_i32_0 : i32, i32
  }
  func.func @transform_4(%arg0: i32) -> (i32, i32) {
    %c0_i32 = arith.constant 0 : i32
    %c0_i32_0 = arith.constant 0 : i32
    %c0_i32_1 = arith.constant 0 : i32
    return %c0_i32, %c0_i32_0 : i32, i32
  }
  func.func @transform_5(%arg0: i32) -> (i32, i32) {
    %c0_i32 = arith.constant 0 : i32
    %c0_i32_0 = arith.constant 0 : i32
    %c0_i32_1 = arith.constant 0 : i32
    return %c0_i32, %c0_i32_0 : i32, i32
  }
}

module attributes {stable_mosaic.version = 11 : i64} {
  func.func @_head_denorm_kernel(%arg0: i32, %arg1: memref<1x4x7x32xf32, #tpu.memory_space<vmem>>, %arg2: memref<4x16x8xf32, #tpu.memory_space<vmem>>, %arg3: memref<1x8xf32, #tpu.memory_space<vmem>>, %arg4: memref<1x1x4xf32, #tpu.memory_space<vmem>>, %arg5: memref<1x1x4xf32, #tpu.memory_space<vmem>>, %arg6: memref<1x8x4xf32, #tpu.memory_space<vmem>>) attributes {dimension_semantics = [#tpu.dimension_semantics<parallel>], iteration_bounds = array<i64: 2>, scalar_prefetch = 0 : i64, scratch_operands = 0 : i64, tpu.core_type = #tpu.core_type<tc>, window_params = [{transform_indices = @transform_0, window_bounds = array<i64: 1, 4, 7, 32>}, {pipeline_mode = #tpu.pipeline_mode<synchronous>, transform_indices = @transform_1, window_bounds = array<i64: 4, 16, 8>}, {pipeline_mode = #tpu.pipeline_mode<synchronous>, transform_indices = @transform_2, window_bounds = array<i64: 1, 8>}, {transform_indices = @transform_3, window_bounds = array<i64: 1, 1, 4>}, {transform_indices = @transform_4, window_bounds = array<i64: 1, 1, 4>}, {transform_indices = @transform_5, window_bounds = array<i64: 1, 8, 4>}]} {
    %c0 = arith.constant 0 : index
    %c0_0 = arith.constant 0 : index
    %c0_1 = arith.constant 0 : index
    %c0_2 = arith.constant 0 : index
    %0 = vector.load %arg1[%c0, %c0_0, %c0_1, %c0_2] : memref<1x4x7x32xf32, #tpu.memory_space<vmem>>, vector<1x4x7x32xf32>
    %1 = vector.shape_cast %0 : vector<1x4x7x32xf32> to vector<4x7x32xf32>
    %c0_3 = arith.constant 0 : index
    %c0_4 = arith.constant 0 : index
    %c0_5 = arith.constant 0 : index
    %2 = vector.load %arg2[%c0_3, %c0_4, %c0_5] : memref<4x16x8xf32, #tpu.memory_space<vmem>>, vector<4x16x8xf32>
    %cst = arith.constant 0.000000e+00 : f32
    %3 = vector.broadcast %cst : f32 to vector<4x8xf32>
    %4 = vector.extract_strided_slice %1 {offsets = [0, 3, 0], sizes = [4, 1, 16], strides = [1, 1, 1]} : vector<4x7x32xf32> to vector<4x1x16xf32>
    %5 = vector.shape_cast %4 : vector<4x1x16xf32> to vector<4x16xf32>
    %6 = vector.extract_strided_slice %2 {offsets = [0, 0, 0], sizes = [1, 16, 8], strides = [1, 1, 1]} : vector<4x16x8xf32> to vector<1x16x8xf32>
    %7 = vector.shape_cast %6 : vector<1x16x8xf32> to vector<16x8xf32>
    %cst_6 = arith.constant dense<0.000000e+00> : vector<4x8xf32>
    %8 = tpu.matmul %5, %7, %cst_6 {dimension_numbers = #tpu.dot_dimension_numbers<[1], [0], [0], [1], [0, 0, 1, 1], [], []>} : vector<4x16xf32>, vector<16x8xf32>, vector<4x8xf32> -> vector<4x8xf32>
    %9 = arith.addf %3, %8 : vector<4x8xf32>
    %10 = vector.extract_strided_slice %1 {offsets = [0, 4, 0], sizes = [4, 1, 16], strides = [1, 1, 1]} : vector<4x7x32xf32> to vector<4x1x16xf32>
    %11 = vector.shape_cast %10 : vector<4x1x16xf32> to vector<4x16xf32>
    %12 = vector.extract_strided_slice %2 {offsets = [1, 0, 0], sizes = [1, 16, 8], strides = [1, 1, 1]} : vector<4x16x8xf32> to vector<1x16x8xf32>
    %13 = vector.shape_cast %12 : vector<1x16x8xf32> to vector<16x8xf32>
    %cst_7 = arith.constant dense<0.000000e+00> : vector<4x8xf32>
    %14 = tpu.matmul %11, %13, %cst_7 {dimension_numbers = #tpu.dot_dimension_numbers<[1], [0], [0], [1], [0, 0, 1, 1], [], []>} : vector<4x16xf32>, vector<16x8xf32>, vector<4x8xf32> -> vector<4x8xf32>
    %15 = arith.addf %9, %14 : vector<4x8xf32>
    %16 = vector.extract_strided_slice %1 {offsets = [0, 5, 0], sizes = [4, 1, 16], strides = [1, 1, 1]} : vector<4x7x32xf32> to vector<4x1x16xf32>
    %17 = vector.shape_cast %16 : vector<4x1x16xf32> to vector<4x16xf32>
    %18 = vector.extract_strided_slice %2 {offsets = [2, 0, 0], sizes = [1, 16, 8], strides = [1, 1, 1]} : vector<4x16x8xf32> to vector<1x16x8xf32>
    %19 = vector.shape_cast %18 : vector<1x16x8xf32> to vector<16x8xf32>
    %cst_8 = arith.constant dense<0.000000e+00> : vector<4x8xf32>
    %20 = tpu.matmul %17, %19, %cst_8 {dimension_numbers = #tpu.dot_dimension_numbers<[1], [0], [0], [1], [0, 0, 1, 1], [], []>} : vector<4x16xf32>, vector<16x8xf32>, vector<4x8xf32> -> vector<4x8xf32>
    %21 = arith.addf %15, %20 : vector<4x8xf32>
    %22 = vector.extract_strided_slice %1 {offsets = [0, 6, 0], sizes = [4, 1, 16], strides = [1, 1, 1]} : vector<4x7x32xf32> to vector<4x1x16xf32>
    %23 = vector.shape_cast %22 : vector<4x1x16xf32> to vector<4x16xf32>
    %24 = vector.extract_strided_slice %2 {offsets = [3, 0, 0], sizes = [1, 16, 8], strides = [1, 1, 1]} : vector<4x16x8xf32> to vector<1x16x8xf32>
    %25 = vector.shape_cast %24 : vector<1x16x8xf32> to vector<16x8xf32>
    %cst_9 = arith.constant dense<0.000000e+00> : vector<4x8xf32>
    %26 = tpu.matmul %23, %25, %cst_9 {dimension_numbers = #tpu.dot_dimension_numbers<[1], [0], [0], [1], [0, 0, 1, 1], [], []>} : vector<4x16xf32>, vector<16x8xf32>, vector<4x8xf32> -> vector<4x8xf32>
    %27 = arith.addf %21, %26 : vector<4x8xf32>
    %c0_10 = arith.constant 0 : index
    %c0_11 = arith.constant 0 : index
    %28 = vector.load %arg3[%c0_10, %c0_11] : memref<1x8xf32, #tpu.memory_space<vmem>>, vector<1x8xf32>
    %29 = vector.broadcast %28 : vector<1x8xf32> to vector<4x8xf32>
    %30 = arith.addf %27, %29 : vector<4x8xf32>
    %31 = tpu.transpose %30, [1, 0] : vector<4x8xf32> -> vector<8x4xf32>
    %c0_12 = arith.constant 0 : index
    %c0_13 = arith.constant 0 : index
    %c0_14 = arith.constant 0 : index
    %32 = vector.load %arg5[%c0_12, %c0_13, %c0_14] : memref<1x1x4xf32, #tpu.memory_space<vmem>>, vector<1x1x4xf32>
    %33 = vector.shape_cast %32 : vector<1x1x4xf32> to vector<1x4xf32>
    %34 = vector.broadcast %33 : vector<1x4xf32> to vector<8x4xf32>
    %35 = arith.mulf %31, %34 : vector<8x4xf32>
    %c0_15 = arith.constant 0 : index
    %c0_16 = arith.constant 0 : index
    %c0_17 = arith.constant 0 : index
    %36 = vector.load %arg4[%c0_15, %c0_16, %c0_17] : memref<1x1x4xf32, #tpu.memory_space<vmem>>, vector<1x1x4xf32>
    %37 = vector.shape_cast %36 : vector<1x1x4xf32> to vector<1x4xf32>
    %38 = vector.broadcast %37 : vector<1x4xf32> to vector<8x4xf32>
    %39 = arith.addf %35, %38 : vector<8x4xf32>
    %c0_18 = arith.constant 0 : index
    %c0_19 = arith.constant 0 : index
    %c0_20 = arith.constant 0 : index
    %40 = vector.load %arg6[%c0_18, %c0_19, %c0_20] : memref<1x8x4xf32, #tpu.memory_space<vmem>>, vector<1x8x4xf32>
    %41 = vector.shape_cast %40 : vector<1x8x4xf32> to vector<8x4xf32>
    %42 = vector.shape_cast %39 : vector<8x4xf32> to vector<1x8x4xf32>
    tpu.vector_store %arg6[%c0_18, %c0_19, %c0_20], %42 {strides = array<i32>} : memref<1x8x4xf32, #tpu.memory_space<vmem>>, vector<1x8x4xf32>,
    return
  }
  func.func @transform_0(%arg0: i32) -> (i32, i32, i32, i32) {
    %c0_i32 = arith.constant 0 : i32
    %c0_i32_0 = arith.constant 0 : i32
    %c0_i32_1 = arith.constant 0 : i32
    %c0_i32_2 = arith.constant 0 : i32
    return %arg0, %c0_i32, %c0_i32_0, %c0_i32_1 : i32, i32, i32, i32
  }
  func.func @transform_1(%arg0: i32) -> (i32, i32, i32) {
    %c0_i32 = arith.constant 0 : i32
    %c0_i32_0 = arith.constant 0 : i32
    %c0_i32_1 = arith.constant 0 : i32
    %c0_i32_2 = arith.constant 0 : i32
    return %c0_i32, %c0_i32_0, %c0_i32_1 : i32, i32, i32
  }
  func.func @transform_2(%arg0: i32) -> (i32, i32) {
    %c0_i32 = arith.constant 0 : i32
    %c0_i32_0 = arith.constant 0 : i32
    %c0_i32_1 = arith.constant 0 : i32
    return %c0_i32, %c0_i32_0 : i32, i32
  }
  func.func @transform_3(%arg0: i32) -> (i32, i32, i32) {
    %c0_i32 = arith.constant 0 : i32
    %c0_i32_0 = arith.constant 0 : i32
    %c0_i32_1 = arith.constant 0 : i32
    return %arg0, %c0_i32, %c0_i32_0 : i32, i32, i32
  }
  func.func @transform_4(%arg0: i32) -> (i32, i32, i32) {
    %c0_i32 = arith.constant 0 : i32
    %c0_i32_0 = arith.constant 0 : i32
    %c0_i32_1 = arith.constant 0 : i32
    return %arg0, %c0_i32, %c0_i32_0 : i32, i32, i32
  }
  func.func @transform_5(%arg0: i32) -> (i32, i32, i32) {
    %c0_i32 = arith.constant 0 : i32
    %c0_i32_0 = arith.constant 0 : i32
    %c0_i32_1 = arith.constant 0 : i32
    return %arg0, %c0_i32, %c0_i32_0 : i32, i32, i32
  }
}

</mosaic_0001>

<bundles_post_ra>
// kernel: _lambda_.3
= control target key start
LH: loop header
LB: loop body
LE: loop exit
PB: predicated region body
PF: predicated region fallthrough
CT: control target
= control target key end

     0   :  { %s806_s18 = smov 0   ;;  %s869_s0 = inlined_call_operand.vmem [shape: f32[2,32,4], index: 0, kind: input, shape index: {}]   ;;  %s870_s1 = inlined_call_operand.vmem [shape: bf16[16,32], index: 1, kind: input, shape index: {}]   ;;  %s871_s2 = inlined_call_operand.vmem [shape: bf16[1,32], index: 2, kind: input, shape index: {}]   ;;  %s872_s3 = inlined_call_operand.vmem [shape: bf16[2,4,128], index: 3, kind: output, shape index: {0}]   ;;  %s873_s4 = inlined_call_operand.vmem [shape: f32[2,1,4], index: 4, kind: output, shape index: {1}]   ;;  %s874_s5 = inlined_call_operand.vmem [shape: f32[2,1,4], index: 5, kind: output, shape index: {2}]  }
   0x1 LB: > { %s696_s19 = sadd.s32 4294967295, %s769_s18   ;;  %p700_p0 = scmp.ge.s32.totalorder %s769_s18, 1  ;;  %s769_s18 = sphi %s806_s18, %s16_s18  }
   0x2   : > { %p192_p1 = scmp.lt.s32.totalorder %s769_s18, 3 }
   0x4   : > { %p193_p2 = pnand %p700_p0, %p192_p1 }
   0x5   : > { %p225_p3 = scmp.lt.s32.totalorder (!%p193_p2), %s696_s19, 1  ;;  %s773_s9 = smov (!%p193_p2), 32  }
   0x6   : > { %196 = sbr.rel (%p193_p2) target bundleno = 524 (0x20c), region = 32  ;;  %s774_s10 = smov (!%p193_p2), 64  }
   0x7   : > { %s775_s11 = smov (!%p193_p2), 96  }
   0xb   : > { %v817_v0 = vld [vmem:[%s870_s1] sm:$0xff]   ;;  %s876_s19 = smov (!%p225_p3, %s696_s19), 1  ;;  %v771_v1 = vmov 0.0   ;;  %vm772_vm0 = vmmov 0   ;;  %vm245_vm1 = vcmask 31744   ;;  %vm296_vm2 = vcmask 24576  }
   0xc   : > { %720 = vmatprep.subr.bf16.mxu0 %v771_v1  ;;  %722 = vmatprep.mubr.msk.bf16.mxu0 %vm772_vm0, %v771_v1  ;;  %s711_s22 = sshll.u32 %s876_s19, 5  ;;  %s236_s28 = scalar_lea.vmem %s873_s4, %s876_s19  ;;  %v299_v48 = vlaneseq  ;;  %vm383_vm5 = vcmask 1043456   ;;  %vm336_vm6 = vcmask 130048   ;;  %vm581_vm7 = vcmask 261120  }
   0xd   : > { %721 = vmatpush3.bf16.msra.mxu0 %v817_v0  ;;  %726 = vmatprep.subr.bf16.mxu1 %v771_v1  ;;  %s229_s25 = scalar_lea.vmem %s869_s0, %s711_s22  ;;  %s239_s6 = scalar_lea.vmem %s874_s5, %s876_s19  ;;  %vm585_vm8 = vcmask 523264   ;;  %vm588_vm9 = vcmask 785408  }
   0xe   : > { %732 = vmatprep.subr.bf16.mxu0 %v771_v1  ;;  %727 = vmatpush3.bf16.msra.mxu1 %v817_v0  ;;  %v241_v2 = vld [vmem:[%s229_s25] sm:$0xff]  ;;  %v242_v3 = vld [vmem:[%s229_s25 + $0x8] sm:$0xff]  ;;  %v243_v4 = vld [vmem:[%s229_s25 + $0x10] sm:$0xff]  ;;  %v300_v49 = vshrl.u32 %v299_v48, 7  ;;  %s703_s12 = sshll.u32 %s876_s19, 1 }
   0xf   : > { %728 = vmatprep.mubr.msk.bf16.mxu1 %vm772_vm0, %v771_v1  ;;  %738 = vmatprep.subr.bf16.mxu1 %v771_v1  ;;  %v244_v5 = vld [vmem:[%s229_s25 + $0x18] sm:$0xff]  ;;  %v246_v6 = vsel %vm245_vm1, %v241_v2, 0.0  ;;  %v247_v7 = vsel %vm245_vm1, %v242_v3, 0.0  ;;  %v249_v8 = vsel %vm245_vm1, %v243_v4, 0.0  ;;  %s233_s15 = scalar_lea.vmem %s872_s3, %s703_s12 }
  0x10   : > { %v248_v9 = vadd.f32 %v247_v7, %v246_v6  ;;  %v251_v10 = vsel %vm245_vm1, %v244_v5, 0.0  ;;  %v301_v50 = vsub.s32 7, %v300_v49  ;;  %v308_v7 = vld [vmem:[%s871_s2] sm:$0x1] }
  0x12   : > { %v250_v11 = vadd.f32 %v249_v8, %v248_v9  ;;  %v309_v8 = vunpack.c.l.bf16 %v308_v7  ;;  %v312_v9 = vsub.s32 0, %v300_v49 }
  0x14   : > { %v252_v12 = vadd.f32 %v251_v10, %v250_v11  ;;  %v313_v10 = vrot.slane %v309_v8, %v312_v9 }
  0x16   : > { %v253_v13 = vrot.slane %v252_v12, 4 }
  0x18   : > { %v254_v14 = vadd.f32 %v253_v13, %v252_v12 }
  0x1a   : > { %v255_v15 = vrot.slane %v254_v14, 2 }
  0x1c   : > { %v256_v16 = vadd.f32 %v255_v15, %v254_v14 }
  0x1e   : > { %v257_v17 = vrot.slane %v256_v16, 1 }
  0x20   : > { %v258_v18 = vadd.f32 %v257_v17, %v256_v16 }
  0x22   : > { %v260_v19 = vmul.f32 0.03125, %v258_v18 }
  0x24   : > { %v261_v20 = vsub.f32 %v241_v2, %v260_v19  ;;  %v262_v21 = vsub.f32 %v242_v3, %v260_v19  ;;  %v263_v22 = vsub.f32 %v243_v4, %v260_v19  ;;  %v264_v23 = vsub.f32 %v244_v5, %v260_v19  ;;  %297 = vst.msk [vmem:[%s236_s28] sm:$0x1] %vm296_vm2, %v260_v19 }
  0x26   : > { %v265_v24 = vmul.f32 %v261_v20, %v261_v20  ;;  %v266_v25 = vmul.f32 %v262_v21, %v262_v21  ;;  %v267_v26 = vmul.f32 %v263_v22, %v263_v22  ;;  %v268_v27 = vmul.f32 %v264_v23, %v264_v23 }
  0x28   : > { %v269_v28 = vsel %vm245_vm1, %v265_v24, 0.0  ;;  %v270_v29 = vsel %vm245_vm1, %v266_v25, 0.0  ;;  %v272_v30 = vsel %vm245_vm1, %v267_v26, 0.0  ;;  %v274_v32 = vsel %vm245_vm1, %v268_v27, 0.0 }
  0x29   : > { %v271_v31 = vadd.f32 %v270_v29, %v269_v28 }
  0x2b   : > { %v273_v33 = vadd.f32 %v272_v30, %v271_v31 }
  0x2d   : > { %v275_v34 = vadd.f32 %v274_v32, %v273_v33 }
  0x2f   : > { %v276_v35 = vrot.slane %v275_v34, 4 }
  0x31   : > { %v277_v36 = vadd.f32 %v276_v35, %v275_v34 }
  0x33   : > { %v278_v37 = vrot.slane %v277_v36, 2 }
  0x35   : > { %v279_v38 = vadd.f32 %v278_v37, %v277_v36 }
  0x37   : > { %v280_v39 = vrot.slane %v279_v38, 1 }
  0x39   : > { %v281_v40 = vadd.f32 %v280_v39, %v279_v38 }
  0x3b   : > { %v282_v41 = vmul.f32 0.03125, %v281_v40 }
  0x3d   : > { %v283_v42 = vadd.f32 1e-05, %v282_v41 }
  0x3f   : > { %759 = vrsqrt.f32 %v283_v42  ;;  %vm286_vm3 = vcmp.eq.f32.partialorder %v283_v42, inf  ;;  %v289_v44 = vand.u32 2147483648, %v283_v42  ;;  %vm288_vm4 = vcmp.eq.f32.partialorder %v283_v42, 0.0 }
  0x4c   : > { %v760_v43 = vpop.eup %759 }
  0x4d   : > { %v285_v45 = vmul.f32 %v760_v43, %v283_v42 }
  0x4f   : > { %v287_v46 = vsel %vm286_vm3, %v283_v42, %v285_v45 }
  0x50   : > { %v290_v47 = vsel %vm288_vm4, %v289_v44, %v287_v46 }
  0x51   : > { %761 = vrcp.f32 %v290_v47  ;;  %298 = vst.msk [vmem:[%s239_s6] sm:$0x1] %vm296_vm2, %v290_v47 }
  0x5e   : > { %v762_v51 = vpop.eup %761 }
  0x5f   : > { %v292_v52 = vmul.f32 %v762_v51, %v261_v20  ;;  %v293_v53 = vmul.f32 %v762_v51, %v262_v21  ;;  %v294_v54 = vmul.f32 %v762_v51, %v263_v22  ;;  %v295_v55 = vmul.f32 %v762_v51, %v264_v23 }
  0x61   : > { %v303_v56 = vpack.c.bf16 %v293_v53, %v292_v52  ;;  %v304_v57 = vpack.c.bf16 %v295_v55, %v294_v54  ;;  %v302_v58 = vrot.slane %v295_v55, %v301_v50 }
  0x63   : > { %314 = vxpose.xlu0.c.b16.start.end [1/1] (short) (narrow) %v303_v56, 16  ;;  %v384_v59 = vrot.slane %v303_v56, 4  ;;  %v385_v60 = vrot.slane %v304_v57, 4  ;;  %448 = vxpose.xlu1.c.b16.start.end [1/1] (short) (narrow) %v304_v57, 16  ;;  %v305_v61 = vpack.c.bf16 %v302_v58, %v302_v58 }
  0x65   : > { %v386_v62 = vsel %vm383_vm5, %v384_v59, %v385_v60  ;;  %v509_v63 = vrot.slane %v305_v61, 4 }
  0x67   : > { %388 = vxpose.xlu0.c.b16.start.end [1/1] (short) (narrow) %v386_v62, 16  ;;  %v510_v2 = vsel %vm383_vm5, %v385_v60, %v509_v63 }
  0x68   : > { %512 = vxpose.xlu1.c.b16.start.end [1/1] (short) (narrow) %v510_v2, 16 }
  0xc5   : > { %v322_v3 = vpop.trf.xlu0  ;;  %v456_v5 = vpop.trf.xlu1 }
  0xc6   : > { %723 = vmatmul.mubr.msk.bf16.vlgmr.msra.gmra.mxu0 %vm336_vm6, %v322_v3 }
  0xc7   : > { %733 = vmatpush3.bf16.msra.mxu0 %v817_v0  ;;  %734 = vmatprep.mubr.msk.bf16.mxu0 %vm772_vm0, %v771_v1 }
  0xc9   : > { %v396_v4 = vpop.trf.xlu0 }
  0xca   : > { %729 = vmatmul.mubr.msk.bf16.vlgmr.msra.gmra.mxu1 %vm336_vm6, %v396_v4  ;;  %v520_v6 = vpop.trf.xlu1 }
  0xcb   : > { %739 = vmatpush3.bf16.msra.mxu1 %v817_v0  ;;  %740 = vmatprep.mubr.msk.bf16.mxu1 %vm772_vm0, %v771_v1 }
  0xce   : > { %735 = vmatmul.mubr.msk.bf16.vlgmr.msra.gmra.mxu0 %vm336_vm6, %v456_v5 }
  0xd2   : > { %741 = vmatmul.mubr.msk.bf16.vlgmr.msra.gmra.mxu1 %vm336_vm6, %v520_v6 }
 0x186   : > { %v374_v11 = vpop.f32.mrf.mxu0 }
 0x187   : > { %v375_v12 = vadd.f32 %v374_v11, %v313_v10 }
 0x188   : > { %v724_v13 = vpop.f32.mrf.mxu0 }
 0x189   : > { %v380_v34 = vpack.c.bf16 %v375_v12, %v375_v12 }
 0x18a   : > { %v377_v14 = vpop.f32.mrf.mxu0  ;;  %v441_v15 = vpop.f32.mrf.mxu1 }
 0x18b   : > { %v442_v16 = vadd.f32 %v441_v15, %v313_v10 }
 0x18c   : > { %v725_v0 = vpop.f32.mrf.mxu0  ;;  %v730_v17 = vpop.f32.mrf.mxu1 }
 0x18d   : > { %v447_v18 = vpack.c.bf16 %v442_v16, %v442_v16 }
 0x18e   : > { %v444_v1 = vpop.f32.mrf.mxu1  ;;  %v501_v19 = vpop.f32.mrf.mxu0 }
 0x18f   : > { %v502_v20 = vadd.f32 %v501_v19, %v313_v10  ;;  %573 = vrot.lane.b32.xlu0 %v447_v18, %s773_s9 }
 0x190   : > { %v731_v21 = vpop.f32.mrf.mxu1  ;;  %v736_v22 = vpop.f32.mrf.mxu0 }
 0x191   : > { %v507_v23 = vpack.c.bf16 %v502_v20, %v502_v20 }
 0x192   : > { %v504_v24 = vpop.f32.mrf.mxu0  ;;  %v565_v25 = vpop.f32.mrf.mxu1 }
 0x193   : > { %v566_v26 = vadd.f32 %v565_v25, %v313_v10  ;;  %576 = vrot.lane.b32.xlu1 %v507_v23, %s774_s10 }
 0x194   : > { %v737_v27 = vpop.f32.mrf.mxu0  ;;  %v742_v28 = vpop.f32.mrf.mxu1 }
 0x195   : > { %v571_v29 = vpack.c.bf16 %v566_v26, %v566_v26 }
 0x196   : > { %v568_v30 = vpop.f32.mrf.mxu1 }
 0x197   : > { %579 = vrot.lane.b32.xlu1 %v571_v29, %s775_s11 }
 0x198   : > { %v743_v31 = vpop.f32.mrf.mxu1 }
 0x201   : > { %v574_v32 = vpop.permute.xlu0 %573 }
 0x202   : > { %v584_v35 = vsel %vm581_vm7, %v380_v34, %v574_v32 }
 0x205   : > { %v577_v33 = vpop.permute.xlu1 %576 }
 0x206   : > { %v587_v36 = vsel %vm585_vm8, %v584_v35, %v577_v33 }
 0x209   : > { %v580_v37 = vpop.permute.xlu1 %579 }
 0x20a   : > { %v590_v38 = vsel %vm588_vm9, %v587_v36, %v580_v37 }
 0x20b   : > { %592 = vst [vmem:[%s233_s15] sm:$0x3] %v590_v38 }
 0x20c PF: > { %s16_s18 = sadd.s32 1, %s769_s18  }
 0x20d   : > { %p13_p4 = scmp.ge.s32.totalorder %s16_s18, 4  }
 0x20f   :  { %15 = sbr.rel (!%p13_p4) target bundleno = 1 (0x1), region = 86 }

// kernel: _lambda_.4
= control target key start
LH: loop header
LB: loop body
LE: loop exit
PB: predicated region body
PF: predicated region fallthrough
CT: control target
= control target key end

     0   :  { %v516_v4 = vmov 0   ;;  %vm181_vm0 = vcmask 257024   ;;  %vm263_vm1 = vcmask 1041409   ;;  %vm265_vm2 = vcmask 1042434   ;;  %s719_s2 = inlined_call_operand.vmem [shape: f32[64,16], index: 2, kind: input, shape index: {}]   ;;  %s720_s1 = inlined_call_operand.vmem [shape: f32[64,32], index: 1, kind: input, shape index: {}]   ;;  %s721_s3 = inlined_call_operand.vmem [shape: f32[16,1], index: 3, kind: input, shape index: {}]   ;;  %s722_s0 = inlined_call_operand.vmem [shape: bf16[8,4,32], index: 0, kind: input, shape index: {}]   ;;  %s723_s4 = inlined_call_operand.vmem [shape: f32[16,32], index: 4, kind: output, shape index: {0}]   ;;  %s724_s5 = inlined_call_operand.vmem [shape: f32[8,16], index: 5, kind: output, shape index: {1}]  }
   0x1   :  { %v20_v0 = vld [vmem:[%s719_s2] sm:$0xff]  ;;  %v21_v1 = vld [vmem:[%s719_s2 + $0x8] sm:$0xff]  ;;  %v35_v2 = vld [vmem:[%s720_s1 + $0x38] sm:$0xff]  ;;  %488 = vset.pattern.permute.xlu1 %v516_v4  ;;  %vm267_vm3 = vcmask 1043459   ;;  %vm269_vm4 = vcmask 1044484   ;;  %vm271_vm5 = vcmask 1045509  }
   0x2   :  { %48 = vxpose.xlu0.b32.start [1/8] (short) (narrow) %v20_v0, 16  ;;  %460 = vmatprep.subr.mxu0 %v35_v2  ;;  %v34_v3 = vld [vmem:[%s720_s1 + $0x30] sm:$0xff]  ;;  %v33_v6 = vld [vmem:[%s720_s1 + $0x28] sm:$0xff]  ;;  %v32_v7 = vld [vmem:[%s720_s1 + $0x20] sm:$0xff]  ;;  %vm273_vm6 = vcmask 1046534   ;;  %vm275_vm7 = vcmask 1047559  }
   0x3   :  { %v22_v5 = vld [vmem:[%s719_s2 + $0x10] sm:$0xff]  ;;  %461 = vmatpush3.msra.mxu0 %v35_v2  ;;  %v36_v8 = vld [vmem:[%s721_s3] sm:$0xff]  ;;  %v37_v9 = vld [vmem:[%s721_s3 + $0x8] sm:$0xff]  ;;  %vm162_vm8 = vcmask 261120   ;;  %vm80_vm9 = vcmask 523264   ;;  %vm518_vm10 = vmmov 0  }
   0x4   :  { %462 = vmatprep.subr.mxu0 %v34_v3  ;;  %40 = vperm.xlu1 %488, %v36_v8   ;;  %v165_v10 = vld [vmem:[%s722_s0] sm:$0x3]  ;;  %v166_v11 = vld [vmem:[%s722_s0 + $0x2] sm:$0x3]  ;;  %v167_v12 = vld [vmem:[%s722_s0 + $0x4] sm:$0x3] }
   0x5   :  { %463 = vmatpush3.msra.mxu0 %v34_v3  ;;  %v168_v13 = vld [vmem:[%s722_s0 + $0x6] sm:$0x3]  ;;  %v169_v14 = vld [vmem:[%s722_s0 + $0x8] sm:$0x3]  ;;  %v170_v15 = vld [vmem:[%s722_s0 + $0xa] sm:$0x3]  ;;  %v173_v16 = vunpack.c.l.bf16 %v165_v10  ;;  %v174_v17 = vunpack.c.l.bf16 %v166_v11  ;;  %v175_v18 = vunpack.c.l.bf16 %v167_v12 }
   0x6   :  { %49 = vxpose.xlu0.b32.cont [2/8] (short) (narrow) %v21_v1, 16  ;;  %464 = vmatprep.subr.mxu0 %v33_v6  ;;  %v31_v19 = vld [vmem:[%s720_s1 + $0x18] sm:$0xff]  ;;  %v171_v20 = vld [vmem:[%s722_s0 + $0xc] sm:$0x3]  ;;  %v172_v21 = vld [vmem:[%s722_s0 + $0xe] sm:$0x3]  ;;  %v176_v22 = vunpack.c.l.bf16 %v168_v13  ;;  %v177_v23 = vunpack.c.l.bf16 %v169_v14  ;;  %v178_v24 = vunpack.c.l.bf16 %v170_v15 }
   0x7   :  { %465 = vmatpush3.msra.mxu0 %v33_v6  ;;  %v179_v25 = vunpack.c.l.bf16 %v171_v20  ;;  %v180_v26 = vunpack.c.l.bf16 %v172_v21  ;;  %v182_v27 = vsel %vm181_vm0, %v173_v16, 0.0  ;;  %v189_v28 = vsel %vm181_vm0, %v174_v17, 0.0  ;;  %v23_v29 = vld [vmem:[%s719_s2 + $0x18] sm:$0xff]  ;;  %v30_v30 = vld [vmem:[%s720_s1 + $0x10] sm:$0xff]  ;;  %v29_v39 = vld [vmem:[%s720_s1 + $0x8] sm:$0xff] }
   0x8   :  { %466 = vmatprep.subr.mxu0 %v32_v7  ;;  %45 = vperm.xlu1 %488, %v37_v9   ;;  %v183_v31 = vrot.slane %v182_v27, 4  ;;  %v190_v32 = vrot.slane %v189_v28, 4  ;;  %v196_v33 = vsel %vm181_vm0, %v175_v18, 0.0  ;;  %v203_v34 = vsel %vm181_vm0, %v176_v22, 0.0  ;;  %v24_v48 = vld [vmem:[%s719_s2 + $0x20] sm:$0xff]  ;;  %v25_v1 = vld [vmem:[%s719_s2 + $0x28] sm:$0xff] }
   0x9   :  { %467 = vmatpush3.msra.mxu0 %v32_v7  ;;  %v197_v35 = vrot.slane %v196_v33, 4  ;;  %v204_v36 = vrot.slane %v203_v34, 4  ;;  %v210_v37 = vsel %vm181_vm0, %v177_v23, 0.0  ;;  %v217_v38 = vsel %vm181_vm0, %v178_v24, 0.0  ;;  %v28_v49 = vld [vmem:[%s720_s1] sm:$0xff] }
   0xa   :  { %50 = vxpose.xlu0.b32.cont [3/8] (short) (narrow) %v22_v5, 16  ;;  %468 = vmatprep.subr.mxu0 %v31_v19  ;;  %v184_v40 = vadd.f32 %v183_v31, %v182_v27  ;;  %v191_v41 = vadd.f32 %v190_v32, %v189_v28  ;;  %v211_v42 = vrot.slane %v210_v37, 4  ;;  %v218_v43 = vrot.slane %v217_v38, 4 }
   0xb   :  { %469 = vmatpush3.msra.mxu0 %v31_v19  ;;  %v198_v44 = vadd.f32 %v197_v35, %v196_v33  ;;  %v205_v45 = vadd.f32 %v204_v36, %v203_v34  ;;  %v224_v46 = vsel %vm181_vm0, %v179_v25, 0.0  ;;  %v231_v47 = vsel %vm181_vm0, %v180_v26, 0.0  ;;  %v26_v19 = vld [vmem:[%s719_s2 + $0x30] sm:$0xff]  ;;  %v27_v35 = vld [vmem:[%s719_s2 + $0x38] sm:$0xff] }
   0xc   :  { %470 = vmatprep.subr.mxu0 %v30_v30  ;;  %v185_v50 = vrot.slane %v184_v40, 2  ;;  %v192_v51 = vrot.slane %v191_v41, 2  ;;  %v212_v52 = vadd.f32 %v211_v42, %v210_v37  ;;  %v219_v53 = vadd.f32 %v218_v43, %v217_v38 }
   0xd   :  { %471 = vmatpush3.msra.mxu0 %v30_v30  ;;  %v199_v54 = vrot.slane %v198_v44, 2  ;;  %v206_v55 = vrot.slane %v205_v45, 2  ;;  %v225_v56 = vrot.slane %v224_v46, 4  ;;  %v232_v57 = vrot.slane %v231_v47, 4 }
   0xe   :  { %51 = vxpose.xlu0.b32.cont [4/8] (short) (narrow) %v23_v29, 16  ;;  %472 = vmatprep.subr.mxu0 %v29_v39  ;;  %v186_v58 = vadd.f32 %v185_v50, %v184_v40  ;;  %v193_v59 = vadd.f32 %v192_v51, %v191_v41  ;;  %v213_v60 = vrot.slane %v212_v52, 2  ;;  %v220_v61 = vrot.slane %v219_v53, 2 }
   0xf   :  { %473 = vmatpush3.msra.mxu0 %v29_v39  ;;  %v200_v62 = vadd.f32 %v199_v54, %v198_v44  ;;  %v207_v63 = vadd.f32 %v206_v55, %v205_v45  ;;  %v226_v0 = vadd.f32 %v225_v56, %v224_v46  ;;  %v233_v10 = vadd.f32 %v232_v57, %v231_v47 }
  0x10   :  { %474 = vmatprep.subr.mxu0 %v28_v49  ;;  %v187_v2 = vrot.slane %v186_v58, 1  ;;  %v194_v3 = vrot.slane %v193_v59, 1  ;;  %v214_v5 = vadd.f32 %v213_v60, %v212_v52  ;;  %v221_v6 = vadd.f32 %v220_v61, %v219_v53 }
  0x11   :  { %475 = vmatpush3.msra.mxu0 %v28_v49  ;;  %v201_v7 = vrot.slane %v200_v62, 1  ;;  %v208_v8 = vrot.slane %v207_v63, 1  ;;  %v227_v9 = vrot.slane %v226_v0, 2  ;;  %v234_v18 = vrot.slane %v233_v10, 2 }
  0x12   :  { %52 = vxpose.xlu0.b32.cont [5/8] (short) (narrow) %v24_v48, 16  ;;  %v188_v11 = vadd.f32 %v187_v2, %v186_v58  ;;  %v195_v12 = vadd.f32 %v194_v3, %v193_v59  ;;  %v215_v13 = vrot.slane %v214_v5, 1  ;;  %v222_v14 = vrot.slane %v221_v6, 1 }
  0x13   :  { %v202_v15 = vadd.f32 %v201_v7, %v200_v62  ;;  %v209_v16 = vadd.f32 %v208_v8, %v207_v63  ;;  %v228_v17 = vadd.f32 %v227_v9, %v226_v0  ;;  %v235_v25 = vadd.f32 %v234_v18, %v233_v10 }
  0x14   :  { %v216_v20 = vadd.f32 %v215_v13, %v214_v5  ;;  %v223_v21 = vadd.f32 %v222_v14, %v221_v6  ;;  %v633_v22 = vmul.f32 0.25, %v188_v11  ;;  %v635_v23 = vmul.f32 0.25, %v195_v12 }
  0x15   :  { %v229_v24 = vrot.slane %v228_v17, 1  ;;  %v637_v26 = vmul.f32 0.25, %v202_v15  ;;  %v639_v27 = vmul.f32 0.25, %v209_v16  ;;  %v236_v32 = vrot.slane %v235_v25, 1 }
  0x16   :  { %53 = vxpose.xlu0.b32.cont [6/8] (short) (narrow) %v25_v1, 16  ;;  %v641_v28 = vmul.f32 0.25, %v216_v20  ;;  %v247_v29 = vmul.f32 %v633_v22, %v633_v22  ;;  %v248_v30 = vmul.f32 %v635_v23, %v635_v23  ;;  %v654_v36 = vmul.f32 0.25, %v223_v21 }
  0x17   :  { %v230_v31 = vadd.f32 %v229_v24, %v228_v17  ;;  %v249_v33 = vmul.f32 %v637_v26, %v637_v26  ;;  %v250_v34 = vmul.f32 %v639_v27, %v639_v27  ;;  %v237_v40 = vadd.f32 %v236_v32, %v235_v25 }
  0x18   :  { %v264_v37 = vsel %vm263_vm1, %v248_v30, %v247_v29  ;;  %v251_v38 = vmul.f32 %v641_v28, %v641_v28  ;;  %v252_v43 = vmul.f32 %v654_v36, %v654_v36  ;;  %v517_v63 = vmov 0.0  }
  0x19   :  { %v266_v39 = vsel %vm265_vm2, %v249_v33, %v264_v37  ;;  %v661_v42 = vmul.f32 0.25, %v230_v31  ;;  %v666_v45 = vmul.f32 0.25, %v237_v40  ;;  %479 = vmatprep.subr.bf16.mxu1 %v517_v63  ;;  %481 = vmatprep.mubr.msk.bf16.mxu1 %vm518_vm10, %v517_v63 }
  0x1a   :  { %54 = vxpose.xlu0.b32.cont [7/8] (short) (narrow) %v26_v19, 16  ;;  %v268_v41 = vsel %vm267_vm3, %v250_v34, %v266_v39 }
  0x1b   :  { %v270_v44 = vsel %vm269_vm4, %v251_v38, %v268_v41  ;;  %v253_v46 = vmul.f32 %v661_v42, %v661_v42  ;;  %v254_v48 = vmul.f32 %v666_v45, %v666_v45 }
  0x1c   :  { %v272_v47 = vsel %vm271_vm5, %v252_v43, %v270_v44 }
  0x1d   :  { %v274_v49 = vsel %vm273_vm6, %v253_v46, %v272_v47 }
  0x1e   :  { %55 = vxpose.xlu0.b32.end [8/8] (short) (narrow) %v27_v35, 16  ;;  %v276_v50 = vsel %vm275_vm7, %v254_v48, %v274_v49 }
  0x1f   :  { %v278_v51 = vsel %vm162_vm8, %v276_v50, 0.0 }
  0x2c   :  { %279 = vadd.xlane.f32.xlu1 %v278_v51 }
  0x47   :  { %489 = vset.pattern.permute.xlu0 %v516_v4 }
  0x7e   :  { %v64_v52 = vpop.trf.xlu0 }
  0x7f   :  { %476 = vmatprep.mubr.msk.f32.mxu0 %vm80_vm9, %v64_v52  ;;  %v41_v54 = vpop.permute.xlu1 %40 }
  0x82   :  { %v65_v53 = vpop.trf.xlu0 }
  0x83   :  { %477 = vmatmul.mubr.msk.f32.vlgmr.msra.gmra.mxu0 %vm80_vm9, %v65_v53  ;;  %v46_v55 = vpop.permute.xlu1 %45 }
  0xb5   :  { %v280_v0 = vpop.xlane.xlu1 %279 }
  0xb6   :  { %490 = vrsqrt.f32 %v280_v0  ;;  %vm283_vm11 = vcmp.eq.f32.partialorder %v280_v0, inf  ;;  %v286_v3 = vand.u32 2147483648, %v280_v0  ;;  %vm285_vm12 = vcmp.eq.f32.partialorder %v280_v0, 0.0 }
  0xc3   :  { %v491_v1 = vpop.eup %490 }
  0xc4   :  { %v282_v2 = vmul.f32 %v491_v1, %v280_v0 }
  0xc6   :  { %v284_v5 = vsel %vm283_vm11, %v280_v0, %v282_v2 }
  0xc7   :  { %v287_v6 = vsel %vm285_vm12, %v286_v3, %v284_v5 }
  0xc8   :  { %v310_v7 = vmax.f32 %v287_v6, 1e-08 }
  0xca   :  { %v312_v8 = vrot.slane %v310_v7, 1  ;;  %v313_v9 = vrot.slane %v310_v7, 2  ;;  %v314_v10 = vrot.slane %v310_v7, 3  ;;  %v315_v11 = vrot.slane %v310_v7, 4 }
  0xcb   :  { %v316_v14 = vrot.slane %v310_v7, 5  ;;  %v317_v15 = vrot.slane %v310_v7, 6  ;;  %v318_v17 = vrot.slane %v310_v7, 7 }
  0xcc   :  { %492 = vrcp.f32 %v312_v8 }
  0xcd   :  { %494 = vrcp.f32 %v313_v9 }
  0xce   :  { %496 = vrcp.f32 %v310_v7 }
  0xcf   :  { %498 = vrcp.f32 %v314_v10 }
  0xd9   :  { %v493_v16 = vpop.eup %492 }
  0xda   :  { %v495_v18 = vpop.eup %494  ;;  %v330_v20 = vmul.f32 %v493_v16, %v635_v23 }
  0xdb   :  { %v497_v19 = vpop.eup %496  ;;  %v332_v21 = vmul.f32 %v495_v18, %v637_v26 }
  0xdc   :  { %v499_v24 = vpop.eup %498  ;;  %v328_v25 = vmul.f32 %v497_v19, %v633_v22  ;;  %v344_v30 = vpack.c.bf16 %v330_v20, %v330_v20 }
  0xdd   :  { %v334_v35 = vmul.f32 %v499_v24, %v639_v27  ;;  %v345_v37 = vpack.c.bf16 %v332_v21, %v332_v21 }
  0xde   :  { %v343_v23 = vpack.c.bf16 %v328_v25, %v328_v25  ;;  %v367_v41 = vunpack.c.l.b16 %v344_v30 }
  0xdf   :  { %v346_v48 = vpack.c.bf16 %v334_v35, %v334_v35  ;;  %v368_v27 = vunpack.c.l.b16 %v345_v37 }
  0xe0   :  { %v366_v52 = vunpack.c.l.b16 %v343_v23  ;;  %v374_v53 = vrot.slane %v367_v41, 7 }
 0x143   :  { %v478_v56 = vpop.f32.mrf.mxu0 }
 0x144   :  { %v677_v57 = vadd.f32 %v478_v56, %v46_v55  ;;  %v369_v55 = vunpack.c.l.b16 %v346_v48 }
 0x145   :  { %v153_v58 = vpop.f32.mrf.mxu0 }
 0x146   :  { %164 = vst.msk [vmem:[%s723_s4 + $0x8] sm:$0xff] %vm162_vm8, %v677_v57  ;;  %v684_v59 = vadd.f32 %v153_v58, %v41_v54  ;;  %v289_v4 = vmul.f32 %v677_v57, %v677_v57  ;;  %v378_v63 = vrot.slane %v369_v55, 5 }
 0x148   :  { %163 = vst.msk [vmem:[%s723_s4] sm:$0xff] %vm162_vm8, %v684_v59  ;;  %v293_v60 = vsel %vm162_vm8, %v289_v4, 0.0  ;;  %v288_v61 = vmul.f32 %v684_v59, %v684_v59  ;;  %v376_v4 = vrot.slane %v368_v27, 6 }
 0x149   :  { %294 = vadd.xlane.f32.xlu1 %v293_v60 }
 0x14a   :  { %v290_v62 = vsel %vm162_vm8, %v288_v61, 0.0 }
 0x14b   :  { %291 = vadd.xlane.f32.xlu0 %v290_v62 }
 0x1d2   :  { %v295_v12 = vpop.xlane.xlu1 %294 }
 0x1d3   :  { %500 = vrsqrt.f32 %v295_v12  ;;  %vm305_vm13 = vcmp.eq.f32.partialorder %v295_v12, inf  ;;  %v308_v34 = vand.u32 2147483648, %v295_v12  ;;  %vm307_vm14 = vcmp.eq.f32.partialorder %v295_v12, 0.0 }
 0x1d4   :  { %v292_v13 = vpop.xlane.xlu0 %291  ;;  %502 = vrcp.f32 %v315_v11 }
 0x1d5   :  { %504 = vrsqrt.f32 %v292_v13  ;;  %vm298_vm15 = vcmp.eq.f32.partialorder %v292_v13, inf  ;;  %v301_v26 = vand.u32 2147483648, %v292_v13  ;;  %vm300_vm0 = vcmp.eq.f32.partialorder %v292_v13, 0.0 }
 0x1d6   :  { %506 = vrcp.f32 %v316_v14 }
 0x1d7   :  { %508 = vrcp.f32 %v317_v15 }
 0x1d8   :  { %510 = vrcp.f32 %v318_v17 }
 0x1e0   :  { %v501_v29 = vpop.eup %500 }
 0x1e1   :  { %v503_v31 = vpop.eup %502  ;;  %v304_v32 = vmul.f32 %v501_v29, %v295_v12 }
 0x1e2   :  { %v505_v33 = vpop.eup %504  ;;  %v336_v46 = vmul.f32 %v503_v31, %v641_v28  ;;  %v375_v28 = vsel %vm263_vm1, %v374_v53, %v366_v52  ;;  %vm435_vm1 = vcmask 130048  }
 0x1e3   :  { %v306_v38 = vsel %vm305_vm13, %v295_v12, %v304_v32  ;;  %v297_v39 = vmul.f32 %v505_v33, %v292_v13  ;;  %v507_v43 = vpop.eup %506  ;;  %v377_v1 = vsel %vm265_vm2, %v376_v4, %v375_v28 }
 0x1e4   :  { %v309_v40 = vsel %vm307_vm14, %v308_v34, %v306_v38  ;;  %v509_v50 = vpop.eup %508  ;;  %v338_v51 = vmul.f32 %v507_v43, %v654_v36  ;;  %v347_v54 = vpack.c.bf16 %v336_v46, %v336_v46  ;;  %v379_v5 = vsel %vm267_vm3, %v378_v63, %v377_v1 }
 0x1e5   :  { %v352_v22 = vmax.f32 %v309_v40, 1e-08  ;;  %v299_v44 = vsel %vm298_vm15, %v292_v13, %v297_v39  ;;  %v511_v56 = vpop.eup %510  ;;  %v340_v58 = vmul.f32 %v509_v50, %v661_v42 }
 0x1e6   :  { %v302_v47 = vsel %vm300_vm0, %v301_v26, %v299_v44  ;;  %v348_v60 = vpack.c.bf16 %v338_v51, %v338_v51  ;;  %v370_v61 = vunpack.c.l.b16 %v347_v54  ;;  %v342_v62 = vmul.f32 %v511_v56, %v666_v45 }
 0x1e7   :  { %512 = vrcp.f32 %v352_v22  ;;  %v351_v49 = vmax.f32 %v302_v47, 1e-08  ;;  %v349_v0 = vpack.c.bf16 %v340_v58, %v340_v58 }
 0x1e8   :  { %v371_v36 = vunpack.c.l.b16 %v348_v60  ;;  %v380_v2 = vrot.slane %v370_v61, 4  ;;  %v350_v3 = vpack.c.bf16 %v342_v62, %v342_v62 }
 0x1e9   :  { %514 = vrcp.f32 %v351_v49  ;;  %v372_v6 = vunpack.c.l.b16 %v349_v0 }
 0x1ea   :  { %v382_v8 = vrot.slane %v371_v36, 3  ;;  %v381_v42 = vsel %vm269_vm4, %v380_v2, %v379_v5  ;;  %v373_v10 = vunpack.c.l.b16 %v350_v3 }
 0x1eb   :  { %v384_v12 = vrot.slane %v372_v6, 2 }
 0x1ec   :  { %v383_v13 = vsel %vm271_vm5, %v382_v8, %v381_v42  ;;  %v386_v15 = vrot.slane %v373_v10, 1 }
 0x1ed   :  { %v385_v17 = vsel %vm273_vm6, %v384_v12, %v383_v13 }
 0x1ee   :  { %v387_v18 = vsel %vm275_vm7, %v386_v15, %v385_v17 }
 0x1ef   :  { %v388_v19 = vpack.c.b16 %v387_v18, %v387_v18 }
 0x1f4   :  { %v513_v7 = vpop.eup %512 }
 0x1f5   :  { %v356_v45 = vmul.f32 %v513_v7, %v677_v57 }
 0x1f6   :  { %v515_v9 = vpop.eup %514 }
 0x1f7   :  { %v354_v11 = vmul.f32 %v515_v9, %v684_v59 }
 0x1f9   :  { %v357_v14 = vpack.c.bf16 %v356_v45, %v354_v11 }
 0x1fb   :  { %v393_v16 = vsel %vm162_vm8, %v357_v14, 0 }
 0x1fc   :  { %480 = vmatpush3.bf16.xpose.msra.mxu1 %v393_v16 }
 0x203   :  { %482 = vmatmul.mubr.msk.bf16.vlgmr.msra.gmra.mxu1 %vm162_vm8, %v388_v19 }
 0x2c3   :  { %v429_v20 = vpop.f32.mrf.mxu1 }
 0x2c4   :  { %436 = vst.msk [vmem:[%s724_s5] sm:$0xff] %vm435_vm1, %v429_v20 }
 0x2c5   :  { %v483_v57 = vpop.f32.mrf.mxu1 }
 0x2c7   :  { %v432_v59 = vpop.f32.mrf.mxu1 }
 0x2c9   :  { %v484_v21 = vpop.f32.mrf.mxu1 }

// kernel: _lambda_.5
= control target key start
LH: loop header
LB: loop body
LE: loop exit
PB: predicated region body
PF: predicated region fallthrough
CT: control target
= control target key end

     0   :  { %s825_s18 = smov 0   ;;  %s913_s0 = inlined_call_operand.vmem [shape: f32[2,4,7,32], index: 0, kind: input, shape index: {}]   ;;  %s914_s1 = inlined_call_operand.vmem [shape: f32[4,16,8], index: 1, kind: input, shape index: {}]   ;;  %s915_s2 = inlined_call_operand.vmem [shape: f32[1,8], index: 2, kind: input, shape index: {}]   ;;  %s916_s3 = inlined_call_operand.vmem [shape: f32[2,1,4], index: 3, kind: input, shape index: {}]   ;;  %s917_s4 = inlined_call_operand.vmem [shape: f32[2,1,4], index: 4, kind: input, shape index: {}]   ;;  %s918_s5 = inlined_call_operand.vmem [shape: f32[2,8,4], index: 5, kind: output, shape index: {}]  }
   0x1 LB: > { %s717_s19 = sadd.s32 4294967295, %s791_s18   ;;  %p721_p0 = scmp.ge.s32.totalorder %s791_s18, 1  ;;  %s791_s18 = sphi %s825_s18, %s15_s18  }
   0x2   : > { %p203_p1 = scmp.lt.s32.totalorder %s791_s18, 3 }
   0x4   : > { %p204_p2 = pnand %p721_p0, %p203_p1 }
   0x5   : > { %p236_p3 = scmp.lt.s32.totalorder (!%p204_p2), %s717_s19, 1 }
   0x6   : > { %207 = sbr.rel (%p204_p2) target bundleno = 354 (0x162), region = 40 }
   0xb   : > { %v258_v0 = vld [vmem:[%s914_s1 + $0x18] sm:$0xff]  ;;  %v256_v1 = vld [vmem:[%s914_s1 + $0x8] sm:$0xff]  ;;  %v793_v2 = vmov 0.0   ;;  %v257_v3 = vld [vmem:[%s914_s1 + $0x10] sm:$0xff]  ;;  %s920_s19 = smov (!%p236_p3, %s717_s19), 1  ;;  %vm794_vm0 = vmmov 0  }
   0xc   : > { %747 = vmatprep.subr.mxu0 %v793_v2  ;;  %754 = vmatprep.subr.mxu1 %v793_v2  ;;  %v255_v4 = vld [vmem:[%s914_s1] sm:$0xff]  ;;  %s734_s28 = sshll.u32 %s920_s19, 5  ;;  %vm269_vm1 = vcmask 1041409   ;;  %vm272_vm2 = vcmask 1042434   ;;  %vm275_vm3 = vcmask 1043459   ;;  %vm277_vm4 = vcmask 130048   ;;  %s246_s21 = scalar_lea.vmem %s917_s4, %s920_s19 }
   0xd   : > { %748 = vmatpush3.msra.mxu0 %v258_v0  ;;  %755 = vmatpush3.msra.mxu1 %v256_v1  ;;  %s240_s6 = scalar_lea.vmem %s913_s0, %s734_s28  ;;  %v260_v23 = vld [vmem:[%s914_s1 + $0x28] sm:$0xff]  ;;  %v262_v28 = vld [vmem:[%s914_s1 + $0x38] sm:$0xff]  ;;  %v259_v32 = vld [vmem:[%s914_s1 + $0x20] sm:$0xff]  ;;  %s243_s24 = scalar_lea.vmem %s916_s3, %s920_s19  ;;  %vm644_vm5 = vcmask 31744  }
   0xe   : > { %749 = vmatprep.subr.mxu0 %v793_v2  ;;  %756 = vmatprep.subr.mxu1 %v793_v2  ;;  %v251_v5 = vld [vmem:[%s240_s6] sm:$0x7f]  ;;  %v252_v6 = vld [vmem:[%s240_s6 + $0x8] sm:$0x7f]  ;;  %v253_v7 = vld [vmem:[%s240_s6 + $0x10] sm:$0x7f] }
   0xf   : > { %750 = vmatpush3.msra.mxu0 %v257_v3  ;;  %751 = vmatprep.mubr.msk.f32.mxu0 %vm794_vm0, %v793_v2  ;;  %v254_v8 = vld [vmem:[%s240_s6 + $0x18] sm:$0x7f]  ;;  %v267_v9 = vrot.slane %v251_v5, 4  ;;  %v268_v10 = vrot.slane %v252_v6, 3  ;;  %v271_v11 = vrot.slane %v253_v7, 2  ;;  %v350_v12 = vrot.slane %v251_v5, 3 }
  0x10   : > { %757 = vmatpush3.msra.mxu1 %v255_v4  ;;  %758 = vmatprep.mubr.msk.f32.mxu1 %vm794_vm0, %v793_v2  ;;  %v274_v13 = vrot.slane %v254_v8, 1  ;;  %v351_v14 = vrot.slane %v252_v6, 2  ;;  %v353_v15 = vrot.slane %v253_v7, 1  ;;  %v428_v16 = vrot.slane %v251_v5, 5  ;;  %v261_v36 = vld [vmem:[%s914_s1 + $0x30] sm:$0xff]  ;;  %s724_s25 = sshll.u32 %s920_s19, 3 }
  0x11   : > { %761 = vmatprep.subr.mxu0 %v793_v2  ;;  %768 = vmatprep.subr.mxu1 %v793_v2  ;;  %v270_v17 = vsel %vm269_vm1, %v268_v10, %v267_v9  ;;  %v429_v18 = vrot.slane %v252_v6, 4  ;;  %v431_v19 = vrot.slane %v253_v7, 3  ;;  %v433_v20 = vrot.slane %v254_v8, 2  ;;  %v729_v49 = vld [vmem:[%s915_s2] ss:$0 sm:$0xff]  ;;  %s250_s28 = scalar_lea.vmem %s918_s5, %s724_s25 }
  0x12   : > { %v273_v21 = vsel %vm272_vm2, %v271_v11, %v270_v17  ;;  %v352_v22 = vsel %vm269_vm1, %v351_v14, %v350_v12  ;;  %v508_v24 = vrot.slane %v251_v5, 6  ;;  %v509_v25 = vrot.slane %v252_v6, 5  ;;  %v730_v53 = vld [vmem:[%s246_s21] ss:$0 sm:$0xff] }
  0x13   : > { %v276_v26 = vsel %vm275_vm3, %v274_v13, %v273_v21  ;;  %v354_v27 = vsel %vm272_vm2, %v353_v15, %v352_v22  ;;  %v430_v29 = vsel %vm269_vm1, %v429_v18, %v428_v16  ;;  %v511_v30 = vrot.slane %v253_v7, 4  ;;  %v731_v54 = vld [vmem:[%s243_s24] ss:$0 sm:$0xff] }
  0x14   : > { %752 = vmatmul.mubr.msk.f32.vlgmr.msra.gmra.mxu0 %vm277_vm4, %v276_v26  ;;  %v355_v31 = vsel %vm275_vm3, %v254_v8, %v354_v27  ;;  %v432_v33 = vsel %vm272_vm2, %v431_v19, %v430_v29  ;;  %v510_v34 = vsel %vm269_vm1, %v509_v25, %v508_v24  ;;  %v513_v35 = vrot.slane %v254_v8, 3 }
  0x15   : > { %759 = vmatmul.mubr.msk.f32.vlgmr.msra.gmra.mxu1 %vm277_vm4, %v355_v31  ;;  %762 = vmatpush3.msra.mxu0 %v260_v23  ;;  %v512_v37 = vsel %vm272_vm2, %v511_v30, %v510_v34  ;;  %v434_v38 = vsel %vm275_vm3, %v433_v20, %v432_v33 }
  0x16   : > { %763 = vmatprep.subr.mxu0 %v793_v2  ;;  %769 = vmatpush3.msra.mxu1 %v262_v28  ;;  %v514_v39 = vsel %vm275_vm3, %v513_v35, %v512_v37 }
  0x17   : > { %764 = vmatpush3.msra.mxu0 %v259_v32  ;;  %770 = vmatprep.subr.mxu1 %v793_v2 }
  0x18   : > { %765 = vmatprep.mubr.msk.f32.mxu0 %vm794_vm0, %v793_v2  ;;  %771 = vmatpush3.msra.mxu1 %v261_v36 }
  0x19   : > { %772 = vmatprep.mubr.msk.f32.mxu1 %vm794_vm0, %v793_v2  ;;  %766 = vmatmul.mubr.msk.f32.vlgmr.msra.gmra.mxu0 %vm277_vm4, %v434_v38 }
  0x1a   : > { %773 = vmatmul.mubr.msk.f32.vlgmr.msra.gmra.mxu1 %vm277_vm4, %v514_v39 }
  0xd4   : > { %v346_v40 = vpop.f32.mrf.mxu0 }
  0xd5   : > { %v424_v41 = vpop.f32.mrf.mxu1 }
  0xd6   : > { %v753_v42 = vpop.f32.mrf.mxu0  ;;  %v425_v44 = vadd.f32 %v424_v41, %v346_v40 }
  0xd7   : > { %v760_v43 = vpop.f32.mrf.mxu1 }
  0xd9   : > { %v503_v45 = vpop.f32.mrf.mxu0 }
  0xda   : > { %v507_v46 = vadd.f32 %v503_v45, %v425_v44  ;;  %v583_v47 = vpop.f32.mrf.mxu1 }
  0xdb   : > { %v767_v48 = vpop.f32.mrf.mxu0 }
  0xdc   : > { %v587_v50 = vadd.f32 %v583_v47, %v507_v46  ;;  %v774_v51 = vpop.f32.mrf.mxu1 }
  0xde   : > { %v595_v52 = vadd.f32 %v729_v49, %v587_v50 }
  0xe0   : > { %596 = vxpose.xlu0.b32.start.end [1/1] (short) (narrow) %v595_v52, 8 }
 0x15c   : > { %v612_v55 = vpop.trf.xlu0 }
 0x15d   : > { %v635_v56 = vmul.f32 %v730_v53, %v612_v55 }
 0x15f   : > { %v643_v57 = vadd.f32 %v731_v54, %v635_v56 }
 0x161   : > { %645 = vst.msk [vmem:[%s250_s28] sm:$0xff] %vm644_vm5, %v643_v57 }
 0x162 PF: > { %s15_s18 = sadd.s32 1, %s791_s18  }
 0x163   : > { %p12_p4 = scmp.ge.s32.totalorder %s15_s18, 4  }
 0x165   :  { %14 = sbr.rel (!%p12_p4) target bundleno = 1 (0x1), region = 76 }

</bundles_post_ra>
